<compile_context>
chip_gen: v7x
topology: tpu7x:2x2x1
jax: 0.10.0
libtpu: 0.0.40
codegen_flags: <defaults>
</compile_context>

<pallas_src>
import functools

import jax
import jax.numpy as jnp
from jax.experimental import pallas as pl
from jax.experimental.pallas import tpu as pltpu

NEG_BIG = -9e15


def _leaky_relu(x, alpha):
    return jnp.where(x > 0, x, alpha * x)


def _elu(x):
    # clamp exp argument so the (discarded) positive branch never produces inf
    return jnp.where(x > 0, x, jnp.exp(jnp.minimum(x, 0.0)) - 1.0)


def _masked_softmax(e, adj_bias):
    e = e + adj_bias
    m = jnp.max(e, axis=-1, keepdims=True)
    p = jnp.exp(e - m)
    return p * pl.reciprocal(jnp.sum(p, axis=-1, keepdims=True), approx=False)


# ----------------------------------------------------------------------------
# Single fused kernel: GAT multi-head attention + output head + QNetwork MLP
# ----------------------------------------------------------------------------
def fused_gat_qnet_kernel(
    x_ref, adj_ref, w_all_ref, a_src_ref, a_dst_ref,
    w_out_ref, a_osrc_ref, a_odst_ref,
    w1_ref, b1_ref, w2_ref, b2_ref,
    out_ref, *, alpha, nheads, nhid,
):
    x = x_ref[...]                                        # [N, F]
    n = x.shape[0]
    c = w_out_ref.shape[1]

    # adjacency -> additive bias, computed once and reused by every head
    adj_bias = jnp.where(adj_ref[...] > 0, 0.0, NEG_BIG)  # [N, N]

    # all heads' linear transform in one MXU pass
    wh_all = jnp.dot(x, w_all_ref[...],
                     preferred_element_type=jnp.float32)  # [N, nheads*H]

    # Per-head attention (statically unrolled). Each head's output is folded
    # directly into the output-head's Wh:  concat(heads) @ W_out
    #   == sum_h elu(att_h @ Wh_h) @ W_out[h*H:(h+1)*H, :]
    wh_o = jnp.zeros((n, c), jnp.float32)
    for h in range(nheads):
        wh = wh_all[:, h * nhid:(h + 1) * nhid]           # [N, H] static slice
        a_s = a_src_ref[h:h + 1, :]                       # [1, H]
        a_d = a_dst_ref[h:h + 1, :]                       # [1, H]
        f_src = jnp.sum(wh * a_s, axis=-1, keepdims=True)  # [N, 1] VPU+XLU
        f_dst = jnp.sum(wh * a_d, axis=-1, keepdims=True)  # [N, 1]
        e = _leaky_relu(f_src + jnp.transpose(f_dst), alpha)   # [N, N]
        att = _masked_softmax(e, adj_bias)
        hp = _elu(jnp.dot(att, wh, preferred_element_type=jnp.float32))  # [N, H]
        wh_o = wh_o + jnp.dot(hp, w_out_ref[h * nhid:(h + 1) * nhid, :],
                              preferred_element_type=jnp.float32)        # [N, C]

    # Output attention head (concat=False) -> ELU -> log_softmax(dim=1)
    f_src = jnp.sum(wh_o * a_osrc_ref[...], axis=-1, keepdims=True)
    f_dst = jnp.sum(wh_o * a_odst_ref[...], axis=-1, keepdims=True)
    e = _leaky_relu(f_src + jnp.transpose(f_dst), alpha)
    att = _masked_softmax(e, adj_bias)
    h_out = _elu(jnp.dot(att, wh_o, preferred_element_type=jnp.float32))  # [N, C]

    hm = jnp.max(h_out, axis=-1, keepdims=True)
    z = h_out - hm
    logp = z - jnp.log(jnp.sum(jnp.exp(z), axis=-1, keepdims=True))

    # QNetwork MLP: Linear -> ReLU -> Linear
    hid = jnp.maximum(
        jnp.dot(logp, w1_ref[...], preferred_element_type=jnp.float32) + b1_ref[...],
        0.0)
    out_ref[...] = (
        jnp.dot(hid, w2_ref[...], preferred_element_type=jnp.float32) + b2_ref[...])


# ----------------------------------------------------------------------------
# Wrapper: pack parameters into lane-friendly layouts and launch one kernel
# ----------------------------------------------------------------------------
def model_forward(state, adj, params, alpha):
    N, F = state.shape
    nheads, _, nhid = params["W_heads"].shape
    Dout = params["q_w2"].shape[1]

    # weight packing (tiny, parameter-only layout plumbing):
    #   W_all[:, h*H:(h+1)*H] == W_heads[h]  ->  x @ W_all = concat_h(x @ W_h)
    w_all = jnp.transpose(params["W_heads"], (1, 0, 2)).reshape(F, nheads * nhid)
    a_src = params["a_src"][..., 0]                 # [nheads, H] rows
    a_dst = params["a_dst"][..., 0]                 # [nheads, H]
    a_osrc = jnp.transpose(params["a_out_src"])     # [1, C]
    a_odst = jnp.transpose(params["a_out_dst"])     # [1, C]

    vmem_specs = [pl.BlockSpec(memory_space=pltpu.MemorySpace.VMEM)
                  for _ in range(12)]
    kernel = functools.partial(
        fused_gat_qnet_kernel, alpha=alpha, nheads=nheads, nhid=nhid)

    return pl.pallas_call(
        kernel,
        out_shape=jax.ShapeDtypeStruct((N, Dout), jnp.float32),
        in_specs=vmem_specs,
        out_specs=pl.BlockSpec(memory_space=pltpu.MemorySpace.VMEM),
    )(state, adj, w_all, a_src, a_dst,
      params["W_out"], a_osrc, a_odst,
      params["q_w1"], params["q_b1"], params["q_w2"], params["q_b2"])


# ----------------------------------------------------------------------------
# Pure-JAX reference (for silent correctness check)
# ----------------------------------------------------------------------------
def _ref_head(x, adj, W, a_s, a_d, alpha, concat):
    wh = x @ W
    e = wh @ a_s + (wh @ a_d).T
    e = jnp.where(e > 0, e, alpha * e)
    e = jnp.where(adj > 0, e, NEG_BIG)
    att = jax.nn.softmax(e, axis=-1)
    hp = att @ wh
    return jax.nn.elu(hp) if concat else hp


def _ref_forward(state, adj, p, alpha):
    heads = [
        _ref_head(state, adj, p["W_heads"][h], p["a_src"][h], p["a_dst"][h], alpha, True)
        for h in range(p["W_heads"].shape[0])
    ]
    x = jnp.concatenate(heads, axis=1)
    x = jax.nn.elu(_ref_head(x, adj, p["W_out"], p["a_out_src"], p["a_out_dst"], alpha, False))
    x = jax.nn.log_softmax(x, axis=1)
    h = jnp.maximum(x @ p["q_w1"] + p["q_b1"], 0.0)
    return h @ p["q_w2"] + p["q_b2"]


if __name__ == "__main__":
    # Small, module-consistent hyperparameters
    N = 16            # number of graph nodes
    state_dim = 8     # args.state_dim (GAT nfeat)
    nhid = 8          # args.hidden
    nheads = 2        # args.nb_heads
    alpha = 0.2       # args.gat_alpha
    q_layer_dim = [16, 32, 4]   # GAT nclass = q_layer_dim[0]
    nclass = q_layer_dim[0]

    key = jax.random.PRNGKey(0)
    ks = jax.random.split(key, 12)

    # Deterministic parameter init (xavier-ish scaled normals)
    params = {
        "W_heads": 0.3 * jax.random.normal(ks[0], (nheads, state_dim, nhid), jnp.float32),
        "a_src": 0.3 * jax.random.normal(ks[1], (nheads, nhid, 1), jnp.float32),
        "a_dst": 0.3 * jax.random.normal(ks[2], (nheads, nhid, 1), jnp.float32),
        "W_out": 0.3 * jax.random.normal(ks[3], (nheads * nhid, nclass), jnp.float32),
        "a_out_src": 0.3 * jax.random.normal(ks[4], (nclass, 1), jnp.float32),
        "a_out_dst": 0.3 * jax.random.normal(ks[5], (nclass, 1), jnp.float32),
        "q_w1": 0.3 * jax.random.normal(ks[6], (q_layer_dim[0], q_layer_dim[1]), jnp.float32),
        "q_b1": 0.1 * jax.random.normal(ks[7], (1, q_layer_dim[1]), jnp.float32),
        "q_w2": 0.3 * jax.random.normal(ks[8], (q_layer_dim[1], q_layer_dim[2]), jnp.float32),
        "q_b2": 0.1 * jax.random.normal(ks[9], (1, q_layer_dim[2]), jnp.float32),
    }

    # Inputs: node features + symmetric binary adjacency with self-loops
    state = jax.random.normal(ks[10], (N, state_dim), jnp.float32)
    adj_rand = (jax.random.uniform(ks[11], (N, N)) > 0.6).astype(jnp.float32)
    adj = jnp.clip(adj_rand + adj_rand.T + jnp.eye(N, dtype=jnp.float32), 0.0, 1.0)

    out = jax.block_until_ready(model_forward(state, adj, params, alpha))

    ref = _ref_forward(state, adj, params, alpha)
    assert out.shape == (N, q_layer_dim[-1])
    assert jnp.allclose(out, ref, atol=1e-4, rtol=1e-4), "mismatch vs JAX reference"

    print("KERNEL_OK")
</pallas_src>

<mosaic_0001>
module attributes {stable_mosaic.version = 11 : i64} {
  func.func @fused_gat_qnet_kernel(%arg0: memref<16x8xf32, #tpu.memory_space<vmem>>, %arg1: memref<16x16xf32, #tpu.memory_space<vmem>>, %arg2: memref<8x16xf32, #tpu.memory_space<vmem>>, %arg3: memref<2x8xf32, #tpu.memory_space<vmem>>, %arg4: memref<2x8xf32, #tpu.memory_space<vmem>>, %arg5: memref<16x16xf32, #tpu.memory_space<vmem>>, %arg6: memref<1x16xf32, #tpu.memory_space<vmem>>, %arg7: memref<1x16xf32, #tpu.memory_space<vmem>>, %arg8: memref<16x32xf32, #tpu.memory_space<vmem>>, %arg9: memref<1x32xf32, #tpu.memory_space<vmem>>, %arg10: memref<32x4xf32, #tpu.memory_space<vmem>>, %arg11: memref<1x4xf32, #tpu.memory_space<vmem>>, %arg12: memref<16x4xf32, #tpu.memory_space<vmem>>) attributes {dimension_semantics = [], scalar_prefetch = 0 : i64, scratch_operands = 0 : i64, tpu.core_type = #tpu.core_type<tc>} {
    %c0 = arith.constant 0 : index
    %c0_0 = arith.constant 0 : index
    %0 = vector.load %arg0[%c0, %c0_0] : memref<16x8xf32, #tpu.memory_space<vmem>>, vector<16x8xf32>
    %c0_1 = arith.constant 0 : index
    %c0_2 = arith.constant 0 : index
    %1 = vector.load %arg1[%c0_1, %c0_2] : memref<16x16xf32, #tpu.memory_space<vmem>>, vector<16x16xf32>
    %cst = arith.constant 0.000000e+00 : f32
    %2 = vector.broadcast %cst : f32 to vector<16x16xf32>
    %3 = arith.cmpf ogt, %1, %2 : vector<16x16xf32>
    %cst_3 = arith.constant 0.000000e+00 : f32
    %cst_4 = arith.constant -9.000000e+15 : f32
    %4 = vector.broadcast %cst_3 : f32 to vector<16x16xf32>
    %5 = vector.broadcast %cst_4 : f32 to vector<16x16xf32>
    %6 = arith.select %3, %4, %5 : vector<16x16xi1>, vector<16x16xf32>
    %c0_5 = arith.constant 0 : index
    %c0_6 = arith.constant 0 : index
    %7 = vector.load %arg2[%c0_5, %c0_6] : memref<8x16xf32, #tpu.memory_space<vmem>>, vector<8x16xf32>
    %cst_7 = arith.constant dense<0.000000e+00> : vector<16x16xf32>
    %8 = tpu.matmul %0, %7, %cst_7 {dimension_numbers = #tpu.dot_dimension_numbers<[1], [0], [0], [1], [0, 0, 1, 1], [], []>} : vector<16x8xf32>, vector<8x16xf32>, vector<16x16xf32> -> vector<16x16xf32>
    %cst_8 = arith.constant 0.000000e+00 : f32
    %9 = vector.broadcast %cst_8 : f32 to vector<16x16xf32>
    %10 = vector.extract_strided_slice %8 {offsets = [0, 0], sizes = [16, 8], strides = [1, 1]} : vector<16x16xf32> to vector<16x8xf32>
    %c0_9 = arith.constant 0 : index
    %c0_10 = arith.constant 0 : index
    %11 = vector.load %arg3[%c0_9, %c0_10] : memref<2x8xf32, #tpu.memory_space<vmem>>, vector<1x8xf32>
    %c0_11 = arith.constant 0 : index
    %c0_12 = arith.constant 0 : index
    %12 = vector.load %arg4[%c0_11, %c0_12] : memref<2x8xf32, #tpu.memory_space<vmem>>, vector<1x8xf32>
    %13 = vector.broadcast %11 : vector<1x8xf32> to vector<16x8xf32>
    %14 = arith.mulf %10, %13 : vector<16x8xf32>
    %cst_13 = arith.constant dense<0.000000e+00> : vector<16xf32>
    %15 = vector.multi_reduction <add>, %14, %cst_13 [1] : vector<16x8xf32> to vector<16xf32>
    %16 = vector.shape_cast %15 : vector<16xf32> to vector<16x1xf32>
    %17 = vector.broadcast %12 : vector<1x8xf32> to vector<16x8xf32>
    %18 = arith.mulf %10, %17 : vector<16x8xf32>
    %cst_14 = arith.constant dense<0.000000e+00> : vector<16xf32>
    %19 = vector.multi_reduction <add>, %18, %cst_14 [1] : vector<16x8xf32> to vector<16xf32>
    %20 = vector.shape_cast %19 : vector<16xf32> to vector<16x1xf32>
    %21 = tpu.transpose %20, [1, 0] : vector<16x1xf32> -> vector<1x16xf32>
    %22 = vector.broadcast %16 : vector<16x1xf32> to vector<16x16xf32>
    %23 = vector.broadcast %21 : vector<1x16xf32> to vector<16x16xf32>
    %24 = arith.addf %22, %23 : vector<16x16xf32>
    %cst_15 = arith.constant 0.000000e+00 : f32
    %25 = vector.broadcast %cst_15 : f32 to vector<16x16xf32>
    %26 = arith.cmpf ogt, %24, %25 : vector<16x16xf32>
    %cst_16 = arith.constant 2.000000e-01 : f32
    %27 = vector.broadcast %cst_16 : f32 to vector<16x16xf32>
    %28 = arith.mulf %27, %24 : vector<16x16xf32>
    %29 = arith.select %26, %24, %28 : vector<16x16xi1>, vector<16x16xf32>
    %30 = arith.addf %29, %6 : vector<16x16xf32>
    %cst_17 = arith.constant dense<0xFF800000> : vector<16xf32>
    %31 = vector.multi_reduction <maximumf>, %30, %cst_17 [1] : vector<16x16xf32> to vector<16xf32>
    %32 = vector.shape_cast %31 : vector<16xf32> to vector<16x1xf32>
    %33 = vector.broadcast %32 : vector<16x1xf32> to vector<16x16xf32>
    %34 = arith.subf %30, %33 : vector<16x16xf32>
    %35 = math.exp %34 : vector<16x16xf32>
    %cst_18 = arith.constant dense<0.000000e+00> : vector<16xf32>
    %36 = vector.multi_reduction <add>, %35, %cst_18 [1] : vector<16x16xf32> to vector<16xf32>
    %37 = vector.shape_cast %36 : vector<16xf32> to vector<16x1xf32>
    %38 = tpu.reciprocal %37 : vector<16x1xf32> -> vector<16x1xf32>
    %39 = vector.broadcast %38 : vector<16x1xf32> to vector<16x16xf32>
    %40 = arith.mulf %35, %39 : vector<16x16xf32>
    %cst_19 = arith.constant dense<0.000000e+00> : vector<16x8xf32>
    %41 = tpu.matmul %40, %10, %cst_19 {dimension_numbers = #tpu.dot_dimension_numbers<[1], [0], [0], [1], [0, 0, 1, 1], [], []>} : vector<16x16xf32>, vector<16x8xf32>, vector<16x8xf32> -> vector<16x8xf32>
    %cst_20 = arith.constant 0.000000e+00 : f32
    %42 = vector.broadcast %cst_20 : f32 to vector<16x8xf32>
    %43 = arith.cmpf ogt, %41, %42 : vector<16x8xf32>
    %cst_21 = arith.constant 0.000000e+00 : f32
    %44 = vector.broadcast %cst_21 : f32 to vector<16x8xf32>
    %45 = arith.minimumf %41, %44 : vector<16x8xf32>
    %46 = math.exp %45 : vector<16x8xf32>
    %cst_22 = arith.constant 1.000000e+00 : f32
    %47 = vector.broadcast %cst_22 : f32 to vector<16x8xf32>
    %48 = arith.subf %46, %47 : vector<16x8xf32>
    %49 = arith.select %43, %41, %48 : vector<16x8xi1>, vector<16x8xf32>
    %c0_23 = arith.constant 0 : index
    %c0_24 = arith.constant 0 : index
    %50 = vector.load %arg5[%c0_23, %c0_24] : memref<16x16xf32, #tpu.memory_space<vmem>>, vector<8x16xf32>
    %cst_25 = arith.constant dense<0.000000e+00> : vector<16x16xf32>
    %51 = tpu.matmul %49, %50, %cst_25 {dimension_numbers = #tpu.dot_dimension_numbers<[1], [0], [0], [1], [0, 0, 1, 1], [], []>} : vector<16x8xf32>, vector<8x16xf32>, vector<16x16xf32> -> vector<16x16xf32>
    %52 = arith.addf %9, %51 : vector<16x16xf32>
    %53 = vector.extract_strided_slice %8 {offsets = [0, 8], sizes = [16, 8], strides = [1, 1]} : vector<16x16xf32> to vector<16x8xf32>
    %c1 = arith.constant 1 : index
    %c0_26 = arith.constant 0 : index
    %54 = vector.load %arg3[%c1, %c0_26] : memref<2x8xf32, #tpu.memory_space<vmem>>, vector<1x8xf32>
    %c1_27 = arith.constant 1 : index
    %c0_28 = arith.constant 0 : index
    %55 = vector.load %arg4[%c1_27, %c0_28] : memref<2x8xf32, #tpu.memory_space<vmem>>, vector<1x8xf32>
    %56 = vector.broadcast %54 : vector<1x8xf32> to vector<16x8xf32>
    %57 = arith.mulf %53, %56 : vector<16x8xf32>
    %cst_29 = arith.constant dense<0.000000e+00> : vector<16xf32>
    %58 = vector.multi_reduction <add>, %57, %cst_29 [1] : vector<16x8xf32> to vector<16xf32>
    %59 = vector.shape_cast %58 : vector<16xf32> to vector<16x1xf32>
    %60 = vector.broadcast %55 : vector<1x8xf32> to vector<16x8xf32>
    %61 = arith.mulf %53, %60 : vector<16x8xf32>
    %cst_30 = arith.constant dense<0.000000e+00> : vector<16xf32>
    %62 = vector.multi_reduction <add>, %61, %cst_30 [1] : vector<16x8xf32> to vector<16xf32>
    %63 = vector.shape_cast %62 : vector<16xf32> to vector<16x1xf32>
    %64 = tpu.transpose %63, [1, 0] : vector<16x1xf32> -> vector<1x16xf32>
    %65 = vector.broadcast %59 : vector<16x1xf32> to vector<16x16xf32>
    %66 = vector.broadcast %64 : vector<1x16xf32> to vector<16x16xf32>
    %67 = arith.addf %65, %66 : vector<16x16xf32>
    %cst_31 = arith.constant 0.000000e+00 : f32
    %68 = vector.broadcast %cst_31 : f32 to vector<16x16xf32>
    %69 = arith.cmpf ogt, %67, %68 : vector<16x16xf32>
    %cst_32 = arith.constant 2.000000e-01 : f32
    %70 = vector.broadcast %cst_32 : f32 to vector<16x16xf32>
    %71 = arith.mulf %70, %67 : vector<16x16xf32>
    %72 = arith.select %69, %67, %71 : vector<16x16xi1>, vector<16x16xf32>
    %73 = arith.addf %72, %6 : vector<16x16xf32>
    %cst_33 = arith.constant dense<0xFF800000> : vector<16xf32>
    %74 = vector.multi_reduction <maximumf>, %73, %cst_33 [1] : vector<16x16xf32> to vector<16xf32>
    %75 = vector.shape_cast %74 : vector<16xf32> to vector<16x1xf32>
    %76 = vector.broadcast %75 : vector<16x1xf32> to vector<16x16xf32>
    %77 = arith.subf %73, %76 : vector<16x16xf32>
    %78 = math.exp %77 : vector<16x16xf32>
    %cst_34 = arith.constant dense<0.000000e+00> : vector<16xf32>
    %79 = vector.multi_reduction <add>, %78, %cst_34 [1] : vector<16x16xf32> to vector<16xf32>
    %80 = vector.shape_cast %79 : vector<16xf32> to vector<16x1xf32>
    %81 = tpu.reciprocal %80 : vector<16x1xf32> -> vector<16x1xf32>
    %82 = vector.broadcast %81 : vector<16x1xf32> to vector<16x16xf32>
    %83 = arith.mulf %78, %82 : vector<16x16xf32>
    %cst_35 = arith.constant dense<0.000000e+00> : vector<16x8xf32>
    %84 = tpu.matmul %83, %53, %cst_35 {dimension_numbers = #tpu.dot_dimension_numbers<[1], [0], [0], [1], [0, 0, 1, 1], [], []>} : vector<16x16xf32>, vector<16x8xf32>, vector<16x8xf32> -> vector<16x8xf32>
    %cst_36 = arith.constant 0.000000e+00 : f32
    %85 = vector.broadcast %cst_36 : f32 to vector<16x8xf32>
    %86 = arith.cmpf ogt, %84, %85 : vector<16x8xf32>
    %cst_37 = arith.constant 0.000000e+00 : f32
    %87 = vector.broadcast %cst_37 : f32 to vector<16x8xf32>
    %88 = arith.minimumf %84, %87 : vector<16x8xf32>
    %89 = math.exp %88 : vector<16x8xf32>
    %cst_38 = arith.constant 1.000000e+00 : f32
    %90 = vector.broadcast %cst_38 : f32 to vector<16x8xf32>
    %91 = arith.subf %89, %90 : vector<16x8xf32>
    %92 = arith.select %86, %84, %91 : vector<16x8xi1>, vector<16x8xf32>
    %c8 = arith.constant 8 : index
    %c0_39 = arith.constant 0 : index
    %93 = vector.load %arg5[%c8, %c0_39] : memref<16x16xf32, #tpu.memory_space<vmem>>, vector<8x16xf32>
    %cst_40 = arith.constant dense<0.000000e+00> : vector<16x16xf32>
    %94 = tpu.matmul %92, %93, %cst_40 {dimension_numbers = #tpu.dot_dimension_numbers<[1], [0], [0], [1], [0, 0, 1, 1], [], []>} : vector<16x8xf32>, vector<8x16xf32>, vector<16x16xf32> -> vector<16x16xf32>
    %95 = arith.addf %52, %94 : vector<16x16xf32>
    %c0_41 = arith.constant 0 : index
    %c0_42 = arith.constant 0 : index
    %96 = vector.load %arg6[%c0_41, %c0_42] : memref<1x16xf32, #tpu.memory_space<vmem>>, vector<1x16xf32>
    %97 = vector.broadcast %96 : vector<1x16xf32> to vector<16x16xf32>
    %98 = arith.mulf %95, %97 : vector<16x16xf32>
    %cst_43 = arith.constant dense<0.000000e+00> : vector<16xf32>
    %99 = vector.multi_reduction <add>, %98, %cst_43 [1] : vector<16x16xf32> to vector<16xf32>
    %100 = vector.shape_cast %99 : vector<16xf32> to vector<16x1xf32>
    %c0_44 = arith.constant 0 : index
    %c0_45 = arith.constant 0 : index
    %101 = vector.load %arg7[%c0_44, %c0_45] : memref<1x16xf32, #tpu.memory_space<vmem>>, vector<1x16xf32>
    %102 = vector.broadcast %101 : vector<1x16xf32> to vector<16x16xf32>
    %103 = arith.mulf %95, %102 : vector<16x16xf32>
    %cst_46 = arith.constant dense<0.000000e+00> : vector<16xf32>
    %104 = vector.multi_reduction <add>, %103, %cst_46 [1] : vector<16x16xf32> to vector<16xf32>
    %105 = vector.shape_cast %104 : vector<16xf32> to vector<16x1xf32>
    %106 = tpu.transpose %105, [1, 0] : vector<16x1xf32> -> vector<1x16xf32>
    %107 = vector.broadcast %100 : vector<16x1xf32> to vector<16x16xf32>
    %108 = vector.broadcast %106 : vector<1x16xf32> to vector<16x16xf32>
    %109 = arith.addf %107, %108 : vector<16x16xf32>
    %cst_47 = arith.constant 0.000000e+00 : f32
    %110 = vector.broadcast %cst_47 : f32 to vector<16x16xf32>
    %111 = arith.cmpf ogt, %109, %110 : vector<16x16xf32>
    %cst_48 = arith.constant 2.000000e-01 : f32
    %112 = vector.broadcast %cst_48 : f32 to vector<16x16xf32>
    %113 = arith.mulf %112, %109 : vector<16x16xf32>
    %114 = arith.select %111, %109, %113 : vector<16x16xi1>, vector<16x16xf32>
    %115 = arith.addf %114, %6 : vector<16x16xf32>
    %cst_49 = arith.constant dense<0xFF800000> : vector<16xf32>
    %116 = vector.multi_reduction <maximumf>, %115, %cst_49 [1] : vector<16x16xf32> to vector<16xf32>
    %117 = vector.shape_cast %116 : vector<16xf32> to vector<16x1xf32>
    %118 = vector.broadcast %117 : vector<16x1xf32> to vector<16x16xf32>
    %119 = arith.subf %115, %118 : vector<16x16xf32>
    %120 = math.exp %119 : vector<16x16xf32>
    %cst_50 = arith.constant dense<0.000000e+00> : vector<16xf32>
    %121 = vector.multi_reduction <add>, %120, %cst_50 [1] : vector<16x16xf32> to vector<16xf32>
    %122 = vector.shape_cast %121 : vector<16xf32> to vector<16x1xf32>
    %123 = tpu.reciprocal %122 : vector<16x1xf32> -> vector<16x1xf32>
    %124 = vector.broadcast %123 : vector<16x1xf32> to vector<16x16xf32>
    %125 = arith.mulf %120, %124 : vector<16x16xf32>
    %cst_51 = arith.constant dense<0.000000e+00> : vector<16x16xf32>
    %126 = tpu.matmul %125, %95, %cst_51 {dimension_numbers = #tpu.dot_dimension_numbers<[1], [0], [0], [1], [0, 0, 1, 1], [], []>} : vector<16x16xf32>, vector<16x16xf32>, vector<16x16xf32> -> vector<16x16xf32>
    %cst_52 = arith.constant 0.000000e+00 : f32
    %127 = vector.broadcast %cst_52 : f32 to vector<16x16xf32>
    %128 = arith.cmpf ogt, %126, %127 : vector<16x16xf32>
    %cst_53 = arith.constant 0.000000e+00 : f32
    %129 = vector.broadcast %cst_53 : f32 to vector<16x16xf32>
    %130 = arith.minimumf %126, %129 : vector<16x16xf32>
    %131 = math.exp %130 : vector<16x16xf32>
    %cst_54 = arith.constant 1.000000e+00 : f32
    %132 = vector.broadcast %cst_54 : f32 to vector<16x16xf32>
    %133 = arith.subf %131, %132 : vector<16x16xf32>
    %134 = arith.select %128, %126, %133 : vector<16x16xi1>, vector<16x16xf32>
    %cst_55 = arith.constant dense<0xFF800000> : vector<16xf32>
    %135 = vector.multi_reduction <maximumf>, %134, %cst_55 [1] : vector<16x16xf32> to vector<16xf32>
    %136 = vector.shape_cast %135 : vector<16xf32> to vector<16x1xf32>
    %137 = vector.broadcast %136 : vector<16x1xf32> to vector<16x16xf32>
    %138 = arith.subf %134, %137 : vector<16x16xf32>
    %139 = math.exp %138 : vector<16x16xf32>
    %cst_56 = arith.constant dense<0.000000e+00> : vector<16xf32>
    %140 = vector.multi_reduction <add>, %139, %cst_56 [1] : vector<16x16xf32> to vector<16xf32>
    %141 = vector.shape_cast %140 : vector<16xf32> to vector<16x1xf32>
    %142 = math.log %141 : vector<16x1xf32>
    %143 = vector.broadcast %142 : vector<16x1xf32> to vector<16x16xf32>
    %144 = arith.subf %138, %143 : vector<16x16xf32>
    %c0_57 = arith.constant 0 : index
    %c0_58 = arith.constant 0 : index
    %145 = vector.load %arg8[%c0_57, %c0_58] : memref<16x32xf32, #tpu.memory_space<vmem>>, vector<16x32xf32>
    %cst_59 = arith.constant dense<0.000000e+00> : vector<16x32xf32>
    %146 = tpu.matmul %144, %145, %cst_59 {dimension_numbers = #tpu.dot_dimension_numbers<[1], [0], [0], [1], [0, 0, 1, 1], [], []>} : vector<16x16xf32>, vector<16x32xf32>, vector<16x32xf32> -> vector<16x32xf32>
    %c0_60 = arith.constant 0 : index
    %c0_61 = arith.constant 0 : index
    %147 = vector.load %arg9[%c0_60, %c0_61] : memref<1x32xf32, #tpu.memory_space<vmem>>, vector<1x32xf32>
    %148 = vector.broadcast %147 : vector<1x32xf32> to vector<16x32xf32>
    %149 = arith.addf %146, %148 : vector<16x32xf32>
    %cst_62 = arith.constant 0.000000e+00 : f32
    %150 = vector.broadcast %cst_62 : f32 to vector<16x32xf32>
    %151 = arith.maximumf %149, %150 : vector<16x32xf32>
    %c0_63 = arith.constant 0 : index
    %c0_64 = arith.constant 0 : index
    %152 = vector.load %arg10[%c0_63, %c0_64] : memref<32x4xf32, #tpu.memory_space<vmem>>, vector<32x4xf32>
    %cst_65 = arith.constant dense<0.000000e+00> : vector<16x4xf32>
    %153 = tpu.matmul %151, %152, %cst_65 {dimension_numbers = #tpu.dot_dimension_numbers<[1], [0], [0], [1], [0, 0, 1, 1], [], []>} : vector<16x32xf32>, vector<32x4xf32>, vector<16x4xf32> -> vector<16x4xf32>
    %c0_66 = arith.constant 0 : index
    %c0_67 = arith.constant 0 : index
    %154 = vector.load %arg11[%c0_66, %c0_67] : memref<1x4xf32, #tpu.memory_space<vmem>>, vector<1x4xf32>
    %155 = vector.broadcast %154 : vector<1x4xf32> to vector<16x4xf32>
    %156 = arith.addf %153, %155 : vector<16x4xf32>
    %c0_68 = arith.constant 0 : index
    %c0_69 = arith.constant 0 : index
    %157 = vector.load %arg12[%c0_68, %c0_69] : memref<16x4xf32, #tpu.memory_space<vmem>>, vector<16x4xf32>
    tpu.vector_store %arg12[%c0_68, %c0_69], %156 {strides = array<i32>} : memref<16x4xf32, #tpu.memory_space<vmem>>, vector<16x4xf32>,
    return
  }
}

</mosaic_0001>

<bundles_post_ra>
// kernel: tpu_custom_call.1
= control target key start
LH: loop header
LB: loop body
LE: loop exit
PB: predicated region body
PF: predicated region fallthrough
CT: control target
= control target key end

     0   :  { %vm50_vm0 = vcmask 64512   ;;  %s1304_s29 = smov 8   ;;  %v190_v37 = vlaneseq  ;;  %v1306_v49 = vmov -9e+15   ;;  %vm204_vm5 = vcmask 130048   ;;  %s1522_s2 = inlined_call_operand.vmem [shape: f32[8,16], index: 2, kind: input, shape index: {}]   ;;  %s1523_s0 = inlined_call_operand.vmem [shape: f32[16,8], index: 0, kind: input, shape index: {}]   ;;  %s1524_s4 = inlined_call_operand.vmem [shape: f32[2,8], index: 4, kind: input, shape index: {}]   ;;  %s1525_s3 = inlined_call_operand.vmem [shape: f32[2,8], index: 3, kind: input, shape index: {}]   ;;  %s1526_s1 = inlined_call_operand.vmem [shape: f32[16,16], index: 1, kind: input, shape index: {}]   ;;  %s1527_s5 = inlined_call_operand.vmem [shape: f32[16,16], index: 5, kind: input, shape index: {}]   ;;  %s1528_s7 = inlined_call_operand.vmem [shape: f32[1,16], index: 7, kind: input, shape index: {}]   ;;  %s1529_s6 = inlined_call_operand.vmem [shape: f32[1,16], index: 6, kind: input, shape index: {}]   ;;  %s1530_s8 = inlined_call_operand.vmem [shape: f32[16,32], index: 8, kind: input, shape index: {}]   ;;  %s1531_s10 = inlined_call_operand.vmem [shape: f32[32,4], index: 10, kind: input, shape index: {}]   ;;  %s1532_s9 = inlined_call_operand.vmem [shape: f32[1,32], index: 9, kind: input, shape index: {}]   ;;  %s1533_s11 = inlined_call_operand.vmem [shape: f32[1,4], index: 11, kind: input, shape index: {}]   ;;  %s1534_s12 = inlined_call_operand.vmem [shape: f32[16,4], index: 12, kind: output, shape index: {}]  }
   0x1   :  { %v49_v0 = vld [vmem:[%s1522_s2] sm:$0xff]  ;;  %v42_v2 = vld [vmem:[%s1523_s0 + $0x8] sm:$0xff] }
   0x2   :  { %v41_v1 = vld [vmem:[%s1523_s0] sm:$0xff]  ;;  %1171 = vmatprep.subr.mxu0 %v49_v0  ;;  %v191_v39 = vshrl.u32 %v190_v37, 7  ;;  %v44_v42 = vld [vmem:[%s1526_s1 + $0x8] sm:$0xff] }
   0x3   :  { %1173 = vmatprep.mubr.msk.f32.mxu0 %vm50_vm0, %v41_v1  ;;  %v1119_v3 = vld [vmem:[%s1524_s4 + $0x1] ss:$0 sm:$0xff]  ;;  %1172 = vmatpush3.msra.mxu0 %v49_v0  ;;  %v1113_v6 = vld [vmem:[%s1524_s4] ss:$0 sm:$0xff]  ;;  %vm46_vm1 = vcmp.gt.f32.partialorder %v44_v42, 0.0 }
   0x4   :  { %352 = vrot.lane.b32.xlu0 %v1119_v3, %s1304_s29  ;;  %1174 = vmatmul.mubr.msk.f32.vlgmr.msra.gmra.mrb[0].mxu0 %vm50_vm0, %v42_v2  ;;  %v1118_v4 = vld [vmem:[%s1525_s3 + $0x1] ss:$0 sm:$0xff]  ;;  %v1112_v7 = vld [vmem:[%s1525_s3] ss:$0 sm:$0xff]  ;;  %s1305_s3 = smov 120   ;;  %v1423_v41 = vsub.s32 0, %v191_v39 }
   0x5   :  { %v43_v43 = vld [vmem:[%s1526_s1] sm:$0xff]  ;;  %v1432_v50 = vsel %vm46_vm1, 0.0, %v1306_v49  ;;  %vm1103_vm1 = vcmask 31744  }
   0x6   :  { %vm45_vm2 = vcmp.gt.f32.partialorder %v43_v43, 0.0 }
   0x7   :  { %v1434_v51 = vsel %vm45_vm2, 0.0, %v1306_v49 }
   0x8   :  { %328 = vrot.lane.b32.xlu0 %v1118_v4, %s1304_s29 }
  0x76   :  { %v353_v5 = vpop.permute.xlu0 %352 }
  0x7a   :  { %v329_v8 = vpop.permute.xlu0 %328 }
  0xd7   :  { %v1395_v9 = vpop.f32.mrb[0].mxu0 }
  0xd8   :  { %v1397_v10 = vpop.f32.mrb[1].mxu0  ;;  %v151_v11 = vmul.f32 %v1395_v9, %v1113_v6  ;;  %v139_v12 = vmul.f32 %v1395_v9, %v1112_v7  ;;  %v356_v18 = vmul.f32 %v1395_v9, %v353_v5  ;;  %v332_v19 = vmul.f32 %v1395_v9, %v329_v8 }
  0xd9   :  { %v355_v13 = vmul.f32 %v353_v5, %v1397_v10  ;;  %v331_v14 = vmul.f32 %v329_v8, %v1397_v10  ;;  %v1225_v15 = vpack.c.bf16 %v1395_v9, %v1397_v10  ;;  %v150_v16 = vmul.f32 %v1113_v6, %v1397_v10 }
  0xda   :  { %v1255_v17 = vpack.i.bf16 %v1395_v9, %v1397_v10  ;;  %v155_v21 = vsel %vm50_vm0, %v151_v11, 0.0  ;;  %v138_v22 = vmul.f32 %v1112_v7, %v1397_v10  ;;  %v143_v30 = vsel %vm50_vm0, %v139_v12, 0.0 }
  0xdb   :  { %359 = vrot.lane.b32.xlu1 %v355_v13, %s1305_s3  ;;  %335 = vrot.lane.b32.xlu0 %v331_v14, %s1305_s3  ;;  %v152_v20 = vsel %vm50_vm0, %v150_v16, 0.0 }
  0xdc   :  { %1226 = vmatprep.subr.bf16.mxu0 %v1225_v15  ;;  %v140_v23 = vsel %vm50_vm0, %v138_v22, 0.0 }
  0xdd   :  { %1228 = vmatpush3.bf16.msra.mxu0 %v1225_v15 }
  0xdf   :  { %361 = vrot.lane.b32.xlu1 %v356_v18, %s1305_s3 }
  0xe3   :  { %337 = vrot.lane.b32.xlu1 %v332_v19, %s1305_s3 }
  0xfa   :  { %153 = vadd.xlane.f32.xlu0 %v152_v20 }
 0x107   :  { %156 = vadd.xlane.f32.xlu1 %v155_v21 }
 0x10b   :  { %141 = vadd.xlane.f32.xlu1 %v140_v23 }
 0x14d   :  { %v360_v24 = vpop.permute.xlu1 %359  ;;  %v336_v25 = vpop.permute.xlu0 %335 }
 0x14e   :  { %v365_v26 = vsel %vm50_vm0, %v360_v24, 0.0  ;;  %v341_v27 = vsel %vm50_vm0, %v336_v25, 0.0 }
 0x14f   :  { %366 = vadd.xlane.f32.xlu0 %v365_v26  ;;  %342 = vadd.xlane.f32.xlu1 %v341_v27 }
 0x151   :  { %v362_v28 = vpop.permute.xlu1 %361 }
 0x152   :  { %v368_v29 = vsel %vm50_vm0, %v362_v28, 0.0 }
 0x153   :  { %369 = vadd.xlane.f32.xlu0 %v368_v29 }
 0x155   :  { %v338_v31 = vpop.permute.xlu1 %337 }
 0x156   :  { %v344_v32 = vsel %vm50_vm0, %v338_v31, 0.0 }
 0x157   :  { %144 = vadd.xlane.f32.xlu0 %v143_v30 }
 0x15b   :  { %345 = vadd.xlane.f32.xlu0 %v344_v32 }
 0x187   :  { %v154_v33 = vpop.xlane.xlu0 %153 }
 0x188   :  { %158 = vxpose.xlu1.b32.start [1/2] (short) (narrow) %v154_v33, 8 }
 0x194   :  { %v157_v34 = vpop.xlane.xlu1 %156 }
 0x195   :  { %159 = vxpose.xlu1.b32.end [2/2] (short) (narrow) %v157_v34, 8 }
 0x198   :  { %v142_v38 = vpop.xlane.xlu1 %141 }
 0x1dc   :  { %v367_v35 = vpop.xlane.xlu0 %366  ;;  %v343_v40 = vpop.xlane.xlu1 %342 }
 0x1dd   :  { %371 = vxpose.xlu0.b32.start [1/2] (short) (narrow) %v367_v35, 8 }
 0x1e0   :  { %v370_v36 = vpop.xlane.xlu0 %369 }
 0x1e1   :  { %372 = vxpose.xlu0.b32.end [2/2] (short) (narrow) %v370_v36, 8 }
 0x1e4   :  { %v145_v46 = vpop.xlane.xlu0 %144 }
 0x1e8   :  { %v346_v60 = vpop.xlane.xlu0 %345 }
 0x211   :  { %v174_v44 = vpop.trf.xlu1 }
 0x212   :  { %v193_v45 = vrot.slane %v174_v44, %v1423_v41 }
 0x214   :  { %v194_v47 = vadd.f32 %v193_v45, %v142_v38  ;;  %v195_v48 = vadd.f32 %v193_v45, %v145_v46  ;;  %v540_v46 = vld [vmem:[%s1527_s5 + $0x8] sm:$0xff] }
 0x215   :  { %1190 = vmatprep.subr.mxu1 %v540_v46 }
 0x216   :  { %v198_v52 = vmul.f32 0.2, %v194_v47  ;;  %v199_v53 = vmul.f32 0.2, %v195_v48  ;;  %vm197_vm3 = vcmp.gt.f32.partialorder %v195_v48, 0.0  ;;  %vm196_vm4 = vcmp.gt.f32.partialorder %v194_v47, 0.0  ;;  %1191 = vmatpush3.msra.mxu1 %v540_v46 }
 0x218   :  { %v201_v54 = vsel %vm197_vm3, %v195_v48, %v199_v53  ;;  %v200_v55 = vsel %vm196_vm4, %v194_v47, %v198_v52  ;;  %v320_v47 = vld [vmem:[%s1527_s5] sm:$0xff] }
 0x219   :  { %v203_v56 = vadd.f32 %v201_v54, %v1432_v50  ;;  %v202_v57 = vadd.f32 %v200_v55, %v1434_v51  ;;  %1195 = vmatprep.subr.mxu1 %v320_v47 }
 0x21b   :  { %v208_v58 = vsel %vm204_vm5, %v203_v56, -inf  ;;  %v205_v59 = vsel %vm204_vm5, %v202_v57, -inf }
 0x21c   :  { %209 = vmax.xlane.f32.xlu1 %v208_v58  ;;  %206 = vmax.xlane.f32.xlu0 %v205_v59 }
 0x25d   :  { %v387_v61 = vpop.trf.xlu0 }
 0x25e   :  { %v406_v62 = vrot.slane %v387_v61, %v1423_v41 }
 0x260   :  { %v407_v63 = vadd.f32 %v406_v62, %v343_v40  ;;  %v408_v0 = vadd.f32 %v406_v62, %v346_v60 }
 0x262   :  { %v411_v1 = vmul.f32 0.2, %v407_v63  ;;  %v412_v2 = vmul.f32 0.2, %v408_v0  ;;  %vm409_vm6 = vcmp.gt.f32.partialorder %v407_v63, 0.0  ;;  %vm410_vm7 = vcmp.gt.f32.partialorder %v408_v0, 0.0 }
 0x264   :  { %v413_v3 = vsel %vm409_vm6, %v407_v63, %v411_v1  ;;  %v414_v4 = vsel %vm410_vm7, %v408_v0, %v412_v2 }
 0x265   :  { %v415_v5 = vadd.f32 %v413_v3, %v1434_v51  ;;  %v416_v6 = vadd.f32 %v414_v4, %v1432_v50 }
 0x267   :  { %v417_v7 = vsel %vm204_vm5, %v415_v5, -inf  ;;  %v420_v8 = vsel %vm204_vm5, %v416_v6, -inf }
 0x268   :  { %418 = vmax.xlane.f32.xlu1 %v417_v7  ;;  %421 = vmax.xlane.f32.xlu0 %v420_v8 }
 0x2a9   :  { %v210_v11 = vpop.xlane.xlu1 %209  ;;  %v207_v12 = vpop.xlane.xlu0 %206 }
 0x2aa   :  { %v212_v13 = vsub.f32 %v203_v56, %v210_v11  ;;  %v211_v14 = vsub.f32 %v202_v57, %v207_v12  ;;  %v1129_v12 = vld [vmem:[%s1528_s7] ss:$0 sm:$0xff] }
 0x2ac   :  { %v215_v15 = vmul.f32 1.442695, %v212_v13  ;;  %v213_v16 = vmul.f32 1.442695, %v211_v14 }
 0x2ae   :  { %1260 = vpow2.f32 %v215_v15 }
 0x2af   :  { %1262 = vpow2.f32 %v213_v16 }
 0x2b8   :  { %v1261_v18 = vpop.eup %1260 }
 0x2b9   :  { %v1263_v19 = vpop.eup %1262  ;;  %v220_v20 = vsel %vm204_vm5, %v1261_v18, 0.0 }
 0x2ba   :  { %221 = vadd.xlane.f32.xlu0 %v220_v20  ;;  %v217_v21 = vsel %vm204_vm5, %v1263_v19, 0.0  ;;  %v1128_v20 = vld [vmem:[%s1529_s6] ss:$0 sm:$0xff] }
 0x2bb   :  { %218 = vadd.xlane.f32.xlu1 %v217_v21 }
 0x2f5   :  { %v419_v22 = vpop.xlane.xlu1 %418  ;;  %v422_v23 = vpop.xlane.xlu0 %421 }
 0x2f6   :  { %v423_v24 = vsub.f32 %v415_v5, %v419_v22  ;;  %v424_v25 = vsub.f32 %v416_v6, %v422_v23 }
 0x2f8   :  { %v425_v26 = vmul.f32 1.442695, %v423_v24  ;;  %v427_v27 = vmul.f32 1.442695, %v424_v25 }
 0x2fa   :  { %1264 = vpow2.f32 %v425_v26 }
 0x2fb   :  { %1266 = vpow2.f32 %v427_v27 }
 0x304   :  { %v1265_v28 = vpop.eup %1264 }
 0x305   :  { %v1267_v29 = vpop.eup %1266  ;;  %v429_v30 = vsel %vm204_vm5, %v1265_v28, 0.0 }
 0x306   :  { %430 = vadd.xlane.f32.xlu1 %v429_v30  ;;  %v432_v31 = vsel %vm204_vm5, %v1267_v29, 0.0 }
 0x307   :  { %433 = vadd.xlane.f32.xlu0 %v432_v31 }
 0x317   :  { %1256 = vrot.lane.b32.xlu1 %v1255_v17, %s1305_s3 }
 0x347   :  { %v222_v32 = vpop.xlane.xlu0 %221 }
 0x348   :  { %v219_v33 = vpop.xlane.xlu1 %218  ;;  %1268 = vrcp.f32 %v222_v32 }
 0x349   :  { %1270 = vrcp.f32 %v219_v33 }
 0x352   :  { %v1269_v34 = vpop.eup %1268 }
 0x353   :  { %v1271_v35 = vpop.eup %1270  ;;  %v226_v36 = vmul.f32 %v1269_v34, %v1261_v18 }
 0x354   :  { %v225_v37 = vmul.f32 %v1271_v35, %v1263_v19 }
 0x356   :  { %1180 = vmatprep.mubr.msk.f32.mxu0 %vm204_vm5, %v225_v37 }
 0x357   :  { %1181 = vmatmul.mubr.msk.f32.vlgmr.msra.gmra.mrb[2].mxu0 %vm204_vm5, %v226_v36 }
 0x393   :  { %v431_v38 = vpop.xlane.xlu1 %430 }
 0x394   :  { %1272 = vrcp.f32 %v431_v38  ;;  %v434_v39 = vpop.xlane.xlu0 %433 }
 0x395   :  { %1274 = vrcp.f32 %v434_v39 }
 0x397   :  { %v1257_v40 = vpop.permute.xlu1 %1256 }
 0x398   :  { %v1259_v42 = vunpack.i.h.bf16 %v1257_v40  ;;  %v1258_v9 = vunpack.i.l.bf16 %v1257_v40 }
 0x39a   :  { %v1229_v10 = vpack.c.bf16 %v1259_v42, %v1258_v9 }
 0x39c   :  { %1230 = vmatprep.subr.bf16.mxu0 %v1229_v10 }
 0x39d   :  { %1232 = vmatpush3.bf16.msra.mxu0 %v1229_v10 }
 0x39e   :  { %v1273_v17 = vpop.eup %1272 }
 0x39f   :  { %v1275_v43 = vpop.eup %1274  ;;  %v437_v44 = vmul.f32 %v1273_v17, %v1265_v28 }
 0x3a0   :  { %v438_v45 = vmul.f32 %v1275_v43, %v1267_v29 }
 0x3a1   :  { %1187 = vmatprep.mubr.msk.f32.mxu0 %vm204_vm5, %v437_v44 }
 0x3a2   :  { %1188 = vmatmul.mubr.msk.f32.vlgmr.msra.gmra.mrb[4].mxu0 %vm204_vm5, %v438_v45 }
 0x42a   :  { %v1182_v48 = vpop.f32.mrb[2].mxu0 }
 0x42b   :  { %v299_v49 = vpop.f32.mrb[3].mxu0  ;;  %v311_v58 = vmin.f32 %v1182_v48, 0.0  ;;  %vm309_vm11 = vcmp.gt.f32.partialorder %v1182_v48, 0.0 }
 0x42c   :  { %v310_v52 = vmin.f32 %v299_v49, 0.0  ;;  %vm308_vm10 = vcmp.gt.f32.partialorder %v299_v49, 0.0 }
 0x42d   :  { %v314_v61 = vmul.f32 1.442695, %v311_v58 }
 0x42e   :  { %v312_v53 = vmul.f32 1.442695, %v310_v52 }
 0x430   :  { %1276 = vpow2.f32 %v312_v53 }
 0x43a   :  { %v1277_v62 = vpop.eup %1276 }
 0x43b   :  { %v1116_v2 = vadd.f32 -1.0, %v1277_v62 }
 0x43d   :  { %v318_v7 = vsel %vm308_vm10, %v299_v49, %v1116_v2 }
 0x475   :  { %v1189_v54 = vpop.f32.mrb[4].mxu0 }
 0x476   :  { %v531_v55 = vmin.f32 %v1189_v54, 0.0  ;;  %v519_v56 = vpop.f32.mrb[5].mxu0  ;;  %vm529_vm9 = vcmp.gt.f32.partialorder %v1189_v54, 0.0 }
 0x477   :  { %v530_v57 = vmin.f32 %v519_v56, 0.0  ;;  %vm528_vm8 = vcmp.gt.f32.partialorder %v519_v56, 0.0 }
 0x478   :  { %v534_v59 = vmul.f32 1.442695, %v531_v55 }
 0x479   :  { %v532_v60 = vmul.f32 1.442695, %v530_v57 }
 0x47a   :  { %1278 = vpow2.f32 %v534_v59 }
 0x47b   :  { %1280 = vpow2.f32 %v532_v60 }
 0x47c   :  { %1282 = vpow2.f32 %v314_v61 }
 0x484   :  { %v1279_v63 = vpop.eup %1278 }
 0x485   :  { %v1281_v0 = vpop.eup %1280  ;;  %v1123_v1 = vadd.f32 -1.0, %v1279_v63 }
 0x486   :  { %v1122_v3 = vadd.f32 -1.0, %v1281_v0  ;;  %v1283_v6 = vpop.eup %1282 }
 0x487   :  { %v539_v5 = vsel %vm529_vm9, %v1189_v54, %v1123_v1  ;;  %v1117_v8 = vadd.f32 -1.0, %v1283_v6 }
 0x488   :  { %v538_v4 = vsel %vm528_vm8, %v519_v56, %v1122_v3 }
 0x489   :  { %1192 = vmatprep.mubr.msk.f32.mxu1 %vm50_vm0, %v538_v4  ;;  %v319_v11 = vsel %vm309_vm11, %v1182_v48, %v1117_v8 }
 0x48a   :  { %1193 = vmatmul.mubr.msk.f32.vlgmr.msra.gmra.mrb[0].mxu1 %vm50_vm0, %v539_v5 }
 0x48b   :  { %1196 = vmatpush3.msra.mxu1 %v320_v47  ;;  %1197 = vmatprep.mubr.msk.f32.mxu1 %vm50_vm0, %v318_v7 }
 0x492   :  { %1198 = vmatmul.mubr.msk.f32.vlgmr.msra.gmra.mrb[0].mxu1 %vm50_vm0, %v319_v11  ;;  %vm1021_vm0 = vcmask 261120  }
 0x565   :  { %v1199_v13 = vpop.f32.mrb[0].mxu1 }
 0x566   :  { %v694_v14 = vpop.f32.mrb[1].mxu1  ;;  %v726_v19 = vmul.f32 %v1199_v13, %v1129_v12  ;;  %v711_v24 = vmul.f32 %v1199_v13, %v1128_v20 }
 0x567   :  { %v1233_v15 = vpack.c.bf16 %v1199_v13, %v694_v14  ;;  %v725_v16 = vmul.f32 %v1129_v12, %v694_v14  ;;  %v710_v22 = vmul.f32 %v1128_v20, %v694_v14 }
 0x568   :  { %v730_v21 = vsel %vm204_vm5, %v726_v19, 0.0  ;;  %v715_v25 = vsel %vm204_vm5, %v711_v24, 0.0  ;;  %v919_v19 = vld [vmem:[%s1530_s8 + $0x8] sm:$0xff] }
 0x569   :  { %1234 = vmatprep.subr.bf16.mxu0 %v1233_v15  ;;  %v727_v18 = vsel %vm204_vm5, %v725_v16, 0.0  ;;  %v712_v23 = vsel %vm204_vm5, %v710_v22, 0.0  ;;  %v1011_v22 = vld [vmem:[%s1531_s10 + $0x8] sm:$0xff] }
 0x56a   :  { %1236 = vmatpush3.bf16.msra.mxu0 %v1233_v15  ;;  %728 = vadd.xlane.f32.xlu0 %v727_v18  ;;  %v918_v18 = vld [vmem:[%s1530_s8] sm:$0xff] }
 0x56b   :  { %v1237_v20 = vpack.c.bf16 %v919_v19, %v918_v18 }
 0x56d   :  { %1238 = vmatprep.subr.bf16.mxu0 %v1237_v20 }
 0x56e   :  { %731 = vadd.xlane.f32.xlu0 %v730_v21  ;;  %v1010_v21 = vld [vmem:[%s1531_s10] sm:$0xff] }
 0x572   :  { %713 = vadd.xlane.f32.xlu0 %v712_v23  ;;  %v1241_v23 = vpack.c.bf16 %v1011_v22, %v1010_v21 }
 0x574   :  { %1242 = vmatprep.subr.bf16.mxu1 %v1241_v23 }
 0x575   :  { %1244 = vmatpush3.bf16.msra.mxu1 %v1241_v23 }
 0x576   :  { %716 = vadd.xlane.f32.xlu0 %v715_v25 }
 0x5f7   :  { %v729_v26 = vpop.xlane.xlu0 %728 }
 0x5f8   :  { %733 = vxpose.xlu1.b32.start [1/2] (short) (narrow) %v729_v26, 8 }
 0x5fb   :  { %v732_v27 = vpop.xlane.xlu0 %731 }
 0x5fc   :  { %734 = vxpose.xlu1.b32.end [2/2] (short) (narrow) %v732_v27, 8 }
 0x5ff   :  { %v714_v28 = vpop.xlane.xlu0 %713 }
 0x603   :  { %v717_v31 = vpop.xlane.xlu0 %716 }
 0x678   :  { %v749_v29 = vpop.trf.xlu1 }
 0x679   :  { %v768_v30 = vrot.slane %v749_v29, %v1423_v41 }
 0x67b   :  { %v769_v32 = vadd.f32 %v768_v30, %v714_v28  ;;  %v770_v33 = vadd.f32 %v768_v30, %v717_v31 }
 0x67d   :  { %v773_v34 = vmul.f32 0.2, %v769_v32  ;;  %v774_v35 = vmul.f32 0.2, %v770_v33  ;;  %vm771_vm12 = vcmp.gt.f32.partialorder %v769_v32, 0.0  ;;  %vm772_vm13 = vcmp.gt.f32.partialorder %v770_v33, 0.0 }
 0x67f   :  { %v775_v36 = vsel %vm771_vm12, %v769_v32, %v773_v34  ;;  %v776_v37 = vsel %vm772_vm13, %v770_v33, %v774_v35  ;;  %v1012_v32 = vld [vmem:[%s1531_s10 + $0x10] sm:$0xff]  ;;  %v1013_v33 = vld [vmem:[%s1531_s10 + $0x18] sm:$0xff]  ;;  %v1134_v35 = vld [vmem:[%s1532_s9] ss:$0 sm:$0xff] }
 0x680   :  { %v777_v38 = vadd.f32 %v775_v36, %v1434_v51  ;;  %v778_v40 = vadd.f32 %v776_v37, %v1432_v50  ;;  %v1245_v34 = vpack.c.bf16 %v1013_v33, %v1012_v32 }
 0x682   :  { %v779_v39 = vsel %vm204_vm5, %v777_v38, -inf  ;;  %v782_v42 = vsel %vm204_vm5, %v778_v40, -inf  ;;  %1246 = vmatprep.subr.bf16.mxu1 %v1245_v34 }
 0x683   :  { %780 = vmax.xlane.f32.xlu0 %v779_v39  ;;  %1248 = vmatpush3.bf16.msra.mxu1 %v1245_v34 }
 0x687   :  { %783 = vmax.xlane.f32.xlu0 %v782_v42 }
 0x710   :  { %v781_v41 = vpop.xlane.xlu0 %780 }
 0x711   :  { %v785_v9 = vsub.f32 %v777_v38, %v781_v41  ;;  %v1137_v41 = vld [vmem:[%s1533_s11] ss:$0 sm:$0xff] }
 0x713   :  { %v787_v10 = vmul.f32 1.442695, %v785_v9 }
 0x714   :  { %v784_v17 = vpop.xlane.xlu0 %783 }
 0x715   :  { %1284 = vpow2.f32 %v787_v10  ;;  %v786_v43 = vsub.f32 %v778_v40, %v784_v17 }
 0x717   :  { %v789_v44 = vmul.f32 1.442695, %v786_v43 }
 0x719   :  { %1286 = vpow2.f32 %v789_v44 }
 0x71f   :  { %v1285_v45 = vpop.eup %1284 }
 0x720   :  { %v791_v46 = vsel %vm204_vm5, %v1285_v45, 0.0 }
 0x721   :  { %792 = vadd.xlane.f32.xlu0 %v791_v46 }
 0x723   :  { %v1287_v51 = vpop.eup %1286 }
 0x724   :  { %v794_v47 = vsel %vm204_vm5, %v1287_v51, 0.0 }
 0x725   :  { %795 = vadd.xlane.f32.xlu0 %v794_v47 }
 0x7ae   :  { %v793_v50 = vpop.xlane.xlu0 %792 }
 0x7af   :  { %1288 = vrcp.f32 %v793_v50 }
 0x7b2   :  { %v796_v48 = vpop.xlane.xlu0 %795 }
 0x7b3   :  { %1290 = vrcp.f32 %v796_v48 }
 0x7b9   :  { %v1289_v49 = vpop.eup %1288 }
 0x7ba   :  { %v799_v52 = vmul.f32 %v1289_v49, %v1285_v45 }
 0x7bc   :  { %1204 = vmatprep.mubr.msk.f32.mxu0 %vm204_vm5, %v799_v52 }
 0x7bd   :  { %v1291_v53 = vpop.eup %1290 }
 0x7be   :  { %v800_v54 = vmul.f32 %v1291_v53, %v1287_v51 }
 0x7c0   :  { %1205 = vmatmul.mubr.msk.f32.vlgmr.msra.gmra.mrb[6].mxu0 %vm204_vm5, %v800_v54 }
 0x7c1   :  { %1240 = vmatpush3.bf16.msra.mxu0 %v1237_v20 }
 0x893   :  { %v1206_v55 = vpop.f32.mrb[6].mxu0 }
 0x894   :  { %v885_v56 = vmin.f32 %v1206_v55, 0.0  ;;  %v873_v57 = vpop.f32.mrb[7].mxu0  ;;  %vm883_vm15 = vcmp.gt.f32.partialorder %v1206_v55, 0.0 }
 0x895   :  { %v884_v58 = vmin.f32 %v873_v57, 0.0  ;;  %vm882_vm14 = vcmp.gt.f32.partialorder %v873_v57, 0.0 }
 0x896   :  { %v888_v59 = vmul.f32 1.442695, %v885_v56 }
 0x897   :  { %v886_v60 = vmul.f32 1.442695, %v884_v58 }
 0x898   :  { %1292 = vpow2.f32 %v888_v59 }
 0x899   :  { %1294 = vpow2.f32 %v886_v60 }
 0x8a2   :  { %v1293_v61 = vpop.eup %1292 }
 0x8a3   :  { %v1295_v62 = vpop.eup %1294  ;;  %v1133_v0 = vadd.f32 -1.0, %v1293_v61 }
 0x8a4   :  { %v1132_v63 = vadd.f32 -1.0, %v1295_v62 }
 0x8a5   :  { %v893_v3 = vsel %vm883_vm15, %v1206_v55, %v1133_v0 }
 0x8a6   :  { %v892_v1 = vsel %vm882_vm14, %v873_v57, %v1132_v63  ;;  %v897_v4 = vsel %vm204_vm5, %v893_v3, -inf }
 0x8a7   :  { %v894_v2 = vsel %vm204_vm5, %v892_v1, -inf }
 0x8a8   :  { %895 = vmax.xlane.f32.xlu0 %v894_v2 }
 0x8ac   :  { %898 = vmax.xlane.f32.xlu0 %v897_v4 }
 0x935   :  { %v896_v5 = vpop.xlane.xlu0 %895 }
 0x936   :  { %v900_v6 = vsub.f32 %v892_v1, %v896_v5 }
 0x938   :  { %v902_v7 = vmul.f32 1.442695, %v900_v6 }
 0x939   :  { %v899_v8 = vpop.xlane.xlu0 %898 }
 0x93a   :  { %1296 = vpow2.f32 %v902_v7  ;;  %v901_v11 = vsub.f32 %v893_v3, %v899_v8 }
 0x93c   :  { %v904_v12 = vmul.f32 1.442695, %v901_v11 }
 0x93e   :  { %1298 = vpow2.f32 %v904_v12 }
 0x944   :  { %v1297_v13 = vpop.eup %1296 }
 0x945   :  { %v906_v14 = vsel %vm204_vm5, %v1297_v13, 0.0 }
 0x946   :  { %907 = vadd.xlane.f32.xlu0 %v906_v14 }
 0x948   :  { %v1299_v15 = vpop.eup %1298 }
 0x949   :  { %v909_v16 = vsel %vm204_vm5, %v1299_v15, 0.0 }
 0x94a   :  { %910 = vadd.xlane.f32.xlu0 %v909_v16 }
 0x9d3   :  { %v908_v24 = vpop.xlane.xlu0 %907 }
 0x9d4   :  { %1300 = vlog2.f32 %v908_v24 }
 0x9d7   :  { %v911_v25 = vpop.xlane.xlu0 %910 }
 0x9d8   :  { %1302 = vlog2.f32 %v911_v25 }
 0x9de   :  { %v1301_v26 = vpop.eup %1300 }
 0x9df   :  { %v913_v27 = vmul.f32 0.6931472, %v1301_v26 }
 0x9e1   :  { %v916_v28 = vsub.f32 %v900_v6, %v913_v27 }
 0x9e2   :  { %v1303_v29 = vpop.eup %1302 }
 0x9e3   :  { %v915_v30 = vmul.f32 0.6931472, %v1303_v29  ;;  %1211 = vmatprep.mubr.msk.f32.mxu0 %vm204_vm5, %v916_v28 }
 0x9e5   :  { %v917_v31 = vsub.f32 %v901_v11, %v915_v30 }
 0x9e7   :  { %1212 = vmatmul.mubr.msk.f32.vlgmr.msra.gmra.mrb[8].mxu0 %vm204_vm5, %v917_v31 }
 0xaba   :  { %v1213_v36 = vpop.f32.mrb[8].mxu0 }
 0xabb   :  { %v1005_v37 = vadd.f32 %v1213_v36, %v1134_v35  ;;  %v999_v38 = vpop.f32.mrb[9].mxu0 }
 0xabc   :  { %v1000_v39 = vadd.f32 %v1134_v35, %v999_v38 }
 0xabd   :  { %v1009_v42 = vmax.f32 %v1005_v37, 0.0 }
 0xabe   :  { %v1008_v40 = vmax.f32 %v1000_v39, 0.0 }
 0xac0   :  { %1222 = vmatprep.mubr.msk.f32.mxu1 %vm1021_vm0, %v1008_v40 }
 0xac1   :  { %1223 = vmatmul.mubr.msk.f32.vlgmr.msra.gmra.mrb[2].mxu1 %vm1021_vm0, %v1009_v42 }
 0xb94   :  { %v1224_v9 = vpop.f32.mrb[2].mxu1 }
 0xb95   :  { %v1100_v10 = vadd.f32 %v1224_v9, %v1137_v41  ;;  %v1094_v17 = vpop.f32.mrb[3].mxu1 }
 0xb96   :  { %v1095_v43 = vadd.f32 %v1137_v41, %v1094_v17 }
 0xb97   :  { %1105 = vst.msk [vmem:[%s1534_s12 + $0x8] sm:$0xff] %vm1103_vm1, %v1100_v10 }
 0xb98   :  { %1104 = vst.msk [vmem:[%s1534_s12] sm:$0xff] %vm1103_vm1, %v1095_v43 }

</bundles_post_ra>
